<compile_context>
chip_gen: v7x
topology: tpu7x:2x2x1
jax: 0.10.0
libtpu: 0.0.40
codegen_flags: <defaults>
</compile_context>

<pallas_src>
import jax
import jax.numpy as jnp
import numpy as np
from jax.experimental import pallas as pl
from jax.experimental.pallas import tpu as pltpu


def _ordinal_kernel(x_ref, ord_ref, dec_ref):
    # x_ref: (TW, C) block, ord_ref: (TW, K), dec_ref: (TW, 1)
    C = x_ref.shape[-1]
    K = C // 2

    x = jnp.clip(x_ref[...].astype(jnp.float32), 1e-8, 1e8)  # (TW, C)

    # Pair-difference / de-interleave matrix: column k selects b_k - a_k,
    # i.e. D[2k+1, k] = +1, D[2k, k] = -1, zeros elsewhere.  Built from iota
    # each step (tiny vs. the data tile), no extra kernel input needed.
    row = jax.lax.broadcasted_iota(jnp.int32, (C, K), 0)
    col = jax.lax.broadcasted_iota(jnp.int32, (C, K), 1)
    D = (jnp.where(row == 2 * col + 1, 1.0, 0.0)
         - jnp.where(row == 2 * col, 1.0, 0.0)).astype(jnp.bfloat16)

    # Exact three-way bf16 split of x (hi + mid + lo == x bit-exactly), so the
    # native bf16 MXU matmuls reproduce clip(b) - clip(a) to ~1 ulp.  The MXU
    # does the even/odd lane de-interleave "for free" (it is otherwise a lane
    # gather the VPU cannot do cheaply); ties give exactly d == 0.
    hi = x.astype(jnp.bfloat16)
    r = x - hi.astype(jnp.float32)
    mid = r.astype(jnp.bfloat16)
    lo = (r - mid.astype(jnp.float32)).astype(jnp.bfloat16)

    d = (jnp.dot(hi, D, preferred_element_type=jnp.float32)
         + jnp.dot(mid, D, preferred_element_type=jnp.float32)
         + jnp.dot(lo, D, preferred_element_type=jnp.float32))  # (TW, K)

    # softmax over the {a, b} pair, probability of b  ==  sigmoid(b - a)
    p = 1.0 / (1.0 + jnp.exp(-d))
    ord_ref[...] = p.astype(ord_ref.dtype)
    # decode label: number of ordinal bins with p > 0.5  <=>  d > 0
    dec_ref[...] = jnp.sum((d > 0).astype(jnp.int32), axis=-1, keepdims=True)


def _round_up(v, m):
    return ((v + m - 1) // m) * m


def _pick_tile_w(N, W, C, target_block_bytes=1 << 20, min_total_steps=8):
    """Rows per block: ~target_block_bytes of lane-padded f32 input, multiple
    of 8 (sublane rule), shrunk so the grid has enough steps to pipeline and
    to shard across TensorCores when N is small."""
    row_bytes = 4 * _round_up(C, 128)                       # lane-padded f32 row
    tw = max(8, (target_block_bytes // row_bytes) // 8 * 8)
    want_w_steps = max(1, -(-min_total_steps // max(N, 1)))  # ceil
    if want_w_steps > 1:
        tw_for_steps = max(8, _round_up(-(-W // want_w_steps), 8))
        tw = min(tw, tw_for_steps)
    return W if tw >= W else tw


def _vmem_limit_bytes(tw, C, K, ord_dtype):
    in_blk = tw * _round_up(C, 128) * 4
    ord_blk = tw * _round_up(K, 128) * np.dtype(ord_dtype).itemsize
    dec_blk = tw * 128 * 4
    # double-buffered in/out blocks + allowance for in-kernel temporaries
    # (hi/mid/lo/d/p) that the compiler materializes in VMEM.
    need = 2 * (in_blk + ord_blk + dec_blk) + 8 * in_blk + 4 * (1 << 20)
    return int(min(max(need, 16 * 1024 * 1024), 48 * 1024 * 1024))


def ordinal_regression_layer(x, *, ord_dtype=jnp.float32,
                             target_block_bytes=1 << 20):
    """x: (N, W, C) with C even (C = 2*ord_num).

    Returns (decode_c: (N, W, 1) int32, ord_c1: (N, W, K) ord_dtype)."""
    N, W, C = x.shape
    assert C % 2 == 0, "channel dim must be even (2 * ord_num)"
    K = C // 2

    tw = _pick_tile_w(N, W, C, target_block_bytes)
    assert tw == W or tw % 8 == 0
    grid = (N, pl.cdiv(W, tw))

    in_spec = pl.BlockSpec((None, tw, C), lambda n, w: (n, w, 0))
    ord_spec = pl.BlockSpec((None, tw, K), lambda n, w: (n, w, 0))
    dec_spec = pl.BlockSpec((None, tw, 1), lambda n, w: (n, w, 0))

    ord_c1, decode_c = pl.pallas_call(
        _ordinal_kernel,
        out_shape=(
            jax.ShapeDtypeStruct((N, W, K), ord_dtype),
            jax.ShapeDtypeStruct((N, W, 1), jnp.int32),
        ),
        grid_spec=pltpu.PrefetchScalarGridSpec(
            num_scalar_prefetch=0,
            grid=grid,
            in_specs=[in_spec],
            out_specs=[ord_spec, dec_spec],
        ),
        compiler_params=pltpu.CompilerParams(
            # pure elementwise per (n, w): both axes independent -> shardable
            # across TensorCores on v7x, harmless on single-TC chips.
            dimension_semantics=("parallel", "parallel"),
            vmem_limit_bytes=_vmem_limit_bytes(tw, C, K, ord_dtype),
        ),
    )(x)

    return decode_c, ord_c1


def _reference(x):
    """Pure-JAX reference mirroring the PyTorch forward exactly."""
    N, W, C = x.shape
    K = C // 2
    xp = jnp.transpose(x, (0, 2, 1))                 # (N, C, W)
    A = xp[:, ::2, :].reshape(N, 1, K * W)
    B = xp[:, 1::2, :].reshape(N, 1, K * W)
    Cc = jnp.concatenate((A, B), axis=1)
    Cc = jnp.clip(Cc, 1e-8, 1e8)
    ord_c = jax.nn.softmax(Cc, axis=1)
    ord_c1 = ord_c[:, 1, :].reshape(N, K, W)
    decode_c = jnp.sum((ord_c1 > 0.5).astype(jnp.int32), axis=1).reshape(N, 1, W)
    return jnp.transpose(decode_c, (0, 2, 1)), jnp.transpose(ord_c1, (0, 2, 1))


if __name__ == "__main__":
    # small shapes: batch=2, width=16, channels=16 (=> ord_num=8)
    N, W, C = 2, 16, 16
    key = jax.random.PRNGKey(0)
    x = jax.random.normal(key, (N, W, C), dtype=jnp.float32) * 3.0

    decode_c, ord_c1 = ordinal_regression_layer(x)
    jax.block_until_ready((decode_c, ord_c1))

    ref_dec, ref_ord = _reference(x)
    np.testing.assert_allclose(np.asarray(ord_c1), np.asarray(ref_ord),
                               rtol=1e-5, atol=1e-6)
    np.testing.assert_array_equal(np.asarray(decode_c), np.asarray(ref_dec))

    print("KERNEL_OK")
</pallas_src>

<mosaic_0001>
module attributes {stable_mosaic.version = 11 : i64} {
  func.func @_ordinal_kernel(%arg0: i32, %arg1: i32, %arg2: memref<1x8x16xf32, #tpu.memory_space<vmem>>, %arg3: memref<1x8x8xf32, #tpu.memory_space<vmem>>, %arg4: memref<1x8x1xi32, #tpu.memory_space<vmem>>) attributes {dimension_semantics = [#tpu.dimension_semantics<parallel>, #tpu.dimension_semantics<parallel>], iteration_bounds = array<i64: 2, 2>, scalar_prefetch = 0 : i64, scratch_operands = 0 : i64, tpu.core_type = #tpu.core_type<tc>, window_params = [{transform_indices = @transform_0, window_bounds = array<i64: 1, 8, 16>}, {transform_indices = @transform_1, window_bounds = array<i64: 1, 8, 8>}, {transform_indices = @transform_2, window_bounds = array<i64: 1, 8, 1>}]} {
    %c0 = arith.constant 0 : index
    %c0_0 = arith.constant 0 : index
    %c0_1 = arith.constant 0 : index
    %0 = vector.load %arg2[%c0, %c0_0, %c0_1] : memref<1x8x16xf32, #tpu.memory_space<vmem>>, vector<1x8x16xf32>
    %1 = vector.shape_cast %0 : vector<1x8x16xf32> to vector<8x16xf32>
    %cst = arith.constant 9.99999993E-9 : f32
    %cst_2 = arith.constant 1.000000e+08 : f32
    %2 = vector.broadcast %cst : f32 to vector<8x16xf32>
    %3 = arith.maximumf %2, %1 : vector<8x16xf32>
    %4 = vector.broadcast %cst_2 : f32 to vector<8x16xf32>
    %5 = arith.minimumf %4, %3 : vector<8x16xf32>
    %6 = tpu.iota {dimensions = array<i32: 0>} : vector<16x8xi32>
    %7 = tpu.iota {dimensions = array<i32: 1>} : vector<16x8xi32>
    %c2_i32 = arith.constant 2 : i32
    %8 = vector.broadcast %c2_i32 : i32 to vector<16x8xi32>
    %9 = arith.muli %8, %7 : vector<16x8xi32>
    %c1_i32 = arith.constant 1 : i32
    %10 = vector.broadcast %c1_i32 : i32 to vector<16x8xi32>
    %11 = arith.addi %9, %10 : vector<16x8xi32>
    %12 = arith.cmpi eq, %6, %11 : vector<16x8xi32>
    %cst_3 = arith.constant 1.000000e+00 : f32
    %cst_4 = arith.constant 0.000000e+00 : f32
    %13 = vector.broadcast %cst_3 : f32 to vector<16x8xf32>
    %14 = vector.broadcast %cst_4 : f32 to vector<16x8xf32>
    %15 = arith.select %12, %13, %14 : vector<16x8xi1>, vector<16x8xf32>
    %c2_i32_5 = arith.constant 2 : i32
    %16 = vector.broadcast %c2_i32_5 : i32 to vector<16x8xi32>
    %17 = arith.muli %16, %7 : vector<16x8xi32>
    %18 = arith.cmpi eq, %6, %17 : vector<16x8xi32>
    %cst_6 = arith.constant 1.000000e+00 : f32
    %cst_7 = arith.constant 0.000000e+00 : f32
    %19 = vector.broadcast %cst_6 : f32 to vector<16x8xf32>
    %20 = vector.broadcast %cst_7 : f32 to vector<16x8xf32>
    %21 = arith.select %18, %19, %20 : vector<16x8xi1>, vector<16x8xf32>
    %22 = arith.subf %15, %21 : vector<16x8xf32>
    %23 = arith.truncf %22 : vector<16x8xf32> to vector<16x8xbf16>
    %24 = arith.truncf %5 : vector<8x16xf32> to vector<8x16xbf16>
    %25 = arith.extf %24 : vector<8x16xbf16> to vector<8x16xf32>
    %26 = arith.subf %5, %25 : vector<8x16xf32>
    %27 = arith.truncf %26 : vector<8x16xf32> to vector<8x16xbf16>
    %28 = arith.extf %27 : vector<8x16xbf16> to vector<8x16xf32>
    %29 = arith.subf %26, %28 : vector<8x16xf32>
    %30 = arith.truncf %29 : vector<8x16xf32> to vector<8x16xbf16>
    %cst_8 = arith.constant dense<0.000000e+00> : vector<8x8xf32>
    %31 = tpu.matmul %24, %23, %cst_8 {dimension_numbers = #tpu.dot_dimension_numbers<[1], [0], [0], [1], [0, 0, 1, 1], [], []>} : vector<8x16xbf16>, vector<16x8xbf16>, vector<8x8xf32> -> vector<8x8xf32>
    %cst_9 = arith.constant dense<0.000000e+00> : vector<8x8xf32>
    %32 = tpu.matmul %27, %23, %cst_9 {dimension_numbers = #tpu.dot_dimension_numbers<[1], [0], [0], [1], [0, 0, 1, 1], [], []>} : vector<8x16xbf16>, vector<16x8xbf16>, vector<8x8xf32> -> vector<8x8xf32>
    %33 = arith.addf %31, %32 : vector<8x8xf32>
    %cst_10 = arith.constant dense<0.000000e+00> : vector<8x8xf32>
    %34 = tpu.matmul %30, %23, %cst_10 {dimension_numbers = #tpu.dot_dimension_numbers<[1], [0], [0], [1], [0, 0, 1, 1], [], []>} : vector<8x16xbf16>, vector<16x8xbf16>, vector<8x8xf32> -> vector<8x8xf32>
    %35 = arith.addf %33, %34 : vector<8x8xf32>
    %cst_11 = arith.constant 0.000000e+00 : f32
    %36 = vector.broadcast %cst_11 : f32 to vector<8x8xf32>
    %37 = arith.subf %36, %35 : vector<8x8xf32>
    %38 = math.exp %37 : vector<8x8xf32>
    %cst_12 = arith.constant 1.000000e+00 : f32
    %39 = vector.broadcast %cst_12 : f32 to vector<8x8xf32>
    %40 = arith.addf %39, %38 : vector<8x8xf32>
    %cst_13 = arith.constant 1.000000e+00 : f32
    %41 = vector.broadcast %cst_13 : f32 to vector<8x8xf32>
    %42 = arith.divf %41, %40 : vector<8x8xf32>
    %c0_14 = arith.constant 0 : index
    %c0_15 = arith.constant 0 : index
    %c0_16 = arith.constant 0 : index
    %43 = vector.load %arg3[%c0_14, %c0_15, %c0_16] : memref<1x8x8xf32, #tpu.memory_space<vmem>>, vector<1x8x8xf32>
    %44 = vector.shape_cast %43 : vector<1x8x8xf32> to vector<8x8xf32>
    %45 = vector.shape_cast %42 : vector<8x8xf32> to vector<1x8x8xf32>
    tpu.vector_store %arg3[%c0_14, %c0_15, %c0_16], %45 {strides = array<i32>} : memref<1x8x8xf32, #tpu.memory_space<vmem>>, vector<1x8x8xf32>,
    %cst_17 = arith.constant 0.000000e+00 : f32
    %46 = vector.broadcast %cst_17 : f32 to vector<8x8xf32>
    %47 = arith.cmpf ogt, %35, %46 : vector<8x8xf32>
    %48 = arith.extui %47 : vector<8x8xi1> to vector<8x8xi32>
    %cst_18 = arith.constant dense<0> : vector<8xi32>
    %49 = vector.multi_reduction <add>, %48, %cst_18 [1] : vector<8x8xi32> to vector<8xi32>
    %50 = vector.shape_cast %49 : vector<8xi32> to vector<8x1xi32>
    %c0_19 = arith.constant 0 : index
    %c0_20 = arith.constant 0 : index
    %c0_21 = arith.constant 0 : index
    %51 = vector.load %arg4[%c0_19, %c0_20, %c0_21] : memref<1x8x1xi32, #tpu.memory_space<vmem>>, vector<1x8x1xi32>
    %52 = vector.shape_cast %51 : vector<1x8x1xi32> to vector<8x1xi32>
    %53 = vector.shape_cast %50 : vector<8x1xi32> to vector<1x8x1xi32>
    tpu.vector_store %arg4[%c0_19, %c0_20, %c0_21], %53 {strides = array<i32>} : memref<1x8x1xi32, #tpu.memory_space<vmem>>, vector<1x8x1xi32>,
    return
  }
  func.func @transform_0(%arg0: i32, %arg1: i32) -> (i32, i32, i32) {
    %c0_i32 = arith.constant 0 : i32
    %c0_i32_0 = arith.constant 0 : i32
    return %arg0, %arg1, %c0_i32 : i32, i32, i32
  }
  func.func @transform_1(%arg0: i32, %arg1: i32) -> (i32, i32, i32) {
    %c0_i32 = arith.constant 0 : i32
    %c0_i32_0 = arith.constant 0 : i32
    return %arg0, %arg1, %c0_i32 : i32, i32, i32
  }
  func.func @transform_2(%arg0: i32, %arg1: i32) -> (i32, i32, i32) {
    %c0_i32 = arith.constant 0 : i32
    %c0_i32_0 = arith.constant 0 : i32
    return %arg0, %arg1, %c0_i32 : i32, i32, i32
  }
}

</mosaic_0001>

<bundles_post_ra>
// kernel: tpu_custom_call.1
= control target key start
LH: loop header
LB: loop body
LE: loop exit
PB: predicated region body
PF: predicated region fallthrough
CT: control target
= control target key end

     0   :  { %8 = vsyncpa [#allocation3], 0  ;;  %s934_s0 = inlined_call_operand.hbm [shape: f32[2,16,16], index: 0, kind: input, shape index: {}]   ;;  %s935_s1 = inlined_call_operand.vmem [shape: f32[2,16,8], index: 1, kind: output, shape index: {0}]   ;;  %s936_s2 = inlined_call_operand.vmem [shape: s32[2,16,1], index: 2, kind: output, shape index: {1}]  }
   0x1   :  { %10 = vsyncpa [#allocation3 + $0x1], 0  ;;  %s774_s9 = smov 0   ;;  %s776_s10 = smov 0  }
   0x2   :  { %s778_s11 = smov 0   ;;  %s780_s12 = smov 0  }
   0x3   :  { %s782_s13 = smov 0   ;;  %s784_s14 = smov 0  }
   0x4   :  { %s786_s15 = smov 0   ;;  %s788_s16 = smov 0  }
   0x5 LB: > { %s532_s17 = sadd.s32 4294967295, %s753_s16   ;;  %s25_s18 = sadd.s32 1, %s745_s14  ;;  %s753_s16 = sphi %s788_s16, %s16_s16   ;;  %s749_s15 = sphi %s786_s15, %s948_s15   ;;  %s745_s14 = sphi %s784_s14, %s947_s14   ;;  %s741_s13 = sphi %s782_s13, %s946_s13   ;;  %s737_s12 = sphi %s780_s12, %s945_s12   ;;  %s733_s11 = sphi %s778_s11, %s944_s11   ;;  %s729_s10 = sphi %s776_s10, %s943_s10   ;;  %s725_s9 = sphi %s774_s9, %s942_s9  }
   0x6   : > { %p26_p0 = scmp.ge.s32.totalorder %s25_s18, 2  ;;  %s28_s19 = sadd.s32 1, %s749_s15 }
   0x7   : > { %s37_s20 = sadd.s32 1, %s733_s11  ;;  %p44_p1 = scmp.ne.s32.totalorder %s733_s11, %s729_s10 }
   0x8   : > { %s950_s18 = smov (%p26_p0, %s25_s18), 0  ;;  %s952_s19 = smov (!%p26_p0, %s28_s19), %s749_s15 }
   0x9   : > { %s33_s21 = ssub.s32 %s745_s14, %s950_s18  ;;  %p45_p2 = scmp.eq.s32.totalorder %s753_s16, 0 }
   0xa   : > { %p30_p3 = scmp.ge.s32.totalorder %s952_s19, 2  ;;  %p50_p4 = scmp.ne.s32.totalorder %s729_s10, %s725_s9 }
   0xb   : > { %p825_p5 = por %p45_p2, %p44_p1  ;;  %p51_p6 = scmp.eq.s32.totalorder %s532_s17, 0 }
   0xc   : > { %s954_s19 = smov (%p30_p3, %s952_s19), 0  ;;  %p585_p8 = scmp.lt.s32.totalorder %s753_s16, 4 }
   0xd   : > { %p831_p7 = por %p51_p6, %p50_p4  ;;  %s32_s24 = ssub.s32 %s749_s15, %s954_s19 }
   0xe   : > { %s34_s25 = sor.u32 %s33_s21, %s32_s24  ;;  %s130_s26 = sand.u32 1, %s733_s11  }
   0xf   : > { %p35_p9 = scmp.eq.s32.totalorder %s34_s25, 0  ;;  %s536_s27 = sshll.u32 %s130_s26, 3 }
  0x10   : > { %s537_s28 = sshll.u32 %s749_s15, 1  ;;  %s134_s4 = scalar_lea.vmem [#allocation2], %s536_s27 }
  0x11   : > { %s841_s29 = scalar_select %p35_p9, %s733_s11, %s37_s20  }
  0x12   : > { %s139_s30 = sadd.s32 %s745_s14, %s537_s28  ;;  %s143_s5 = sshll.u32 %s134_s4, 4  ;;  %s849_s5 = int_to_ptr.vmem [resolvable:$true] %s143_s5 }
  0x13   : > { %s538_s3 = sshll.u32 %s139_s30, 7  ;;  %p855_p10 = pnand %p585_p8, %p825_p5 }
  0x14   : > { %s847_s8 = scalar_lea.hbm %s934_s0, %s538_s3  ;;  %s131_s17 = scalar_lea.sflag [#allocation3], %s130_s26 }
  0x15   : > { %s657_s20 = scalar_lea.hbm %s847_s8, 128  ;;  %p659_p0 = pneg %p855_p10 }
  0x16   : > { %p658_p13 = scmp.ne.s32.totalorder %s847_s8, %s657_s20  ;;  %s662_s24 = scalar_lea.hbm %s934_s0, 512 }
  0x17   : > { %p663_p3 = scmp.lt.u32.totalorder %s847_s8, %s934_s0  ;;  %p664_p4 = scmp.lt.u32.totalorder %s662_s24, %s657_s20 }
  0x18   : > { %p660_p1 = pnand %p659_p0, %p658_p13  ;;  %p666_p6 = scmp.lt.u32.totalorder %s657_s20, %s847_s8 }
  0x19   : > { %p665_p5 = por %p664_p4, %p663_p3 }
  0x1a   : > { %p661_p2 = pneg %p660_p1 }
  0x1b   : > { %p667_p8 = por %p666_p6, %p665_p5 }
  0x1d   : > { %p668_p9 = pnand %p667_p8, %p661_p2 }
  0x1f   : > { %671 = shalt.err (!%p668_p9)
}
  0x20   : > { %s672_s26 = scalar_lea.vmem %s849_s5, 128  ;;  %s755_s28 = smov [#allocation2]  }
  0x21   : > { %p673_p13 = scmp.ne.s32.totalorder %s849_s5, %s672_s26  ;;  %s677_s30 = sshll.u32 %s755_s28, 4  ;;  %s678_s30 = int_to_ptr.vmem [resolvable:$false] %s677_s30 }
  0x22   : > { %s679_s3 = scalar_lea.vmem %s678_s30, 256  ;;  %p680_p12 = scmp.lt.s32.totalorder %s849_s5, %s678_s30 }
  0x23   : > { %p675_p1 = pnand %p673_p13, %p659_p0  ;;  %p681_p3 = scmp.lt.s32.totalorder %s679_s3, %s672_s26 }
  0x25   : > { %p676_p11 = pneg %p675_p1  ;;  %p682_p4 = por %p681_p3, %p680_p12 }
  0x27   : > { %p683_p5 = pnand %p682_p4, %p676_p11 }
  0x29   : > { %686 = shalt.err (!%p683_p5)
}
  0x2a   : > { %584 = dma.hbm_to_vmem [thread:$0]  (!%p855_p10), %s847_s8, 128, %s849_s5, %s131_s17  }
  0x2b   : > { %p940_p2 = scmp.lt.s32.totalorder %s753_s16, 5  ;;  %p941_p6 = scmp.ge.s32.totalorder %s753_s16, 1 }
  0x2d   : > { %p149_p0 = pnand %p941_p6, %p940_p2 }
  0x2e   : > { %s154_s4 = sand.u32 (!%p149_p0), 1, %s729_s10  }
  0x2f   : > { %152 = sbr.rel (%p149_p0) target bundleno = 456 (0x1c8), region = 24  ;;  %s540_s6 = sshll.u32 (!%p149_p0), %s154_s4, 3 }
  0x30   : > { %s155_s7 = scalar_lea.sflag (!%p149_p0), [#allocation3], %s154_s4  ;;  %s158_s20 = scalar_lea.vmem (!%p149_p0), [#allocation2], %s540_s6 }
  0x36   : > { %720 = dma.done.wait (%p831_p7), %s155_s7, 128  }
  0x37   : > { %722 = vsyncadd (%p831_p7), %s155_s7, 4294967168  ;;  %v210_v0 = vlaneseq  ;;  %v756_v1 = vmov 0.0   ;;  %vm757_vm0 = vmmov 0   ;;  %v207_v9 = vld [vmem:[%s158_s20] sm:$0xff]  ;;  %vm235_vm5 = vcmask 130048   ;;  %p190_p7 = scmp.lt.s32.totalorder %s741_s13, 1 }
  0x38   : > { %562 = vmatprep.subr.bf16.mxu0 %v756_v1  ;;  %564 = vmatprep.mubr.msk.bf16.mxu0 %vm757_vm0, %v756_v1  ;;  %v208_v10 = vmax.f32 %v207_v9, 1e-08  ;;  %vm372_vm6 = vcmask 64512   ;;  %v758_v34 = vmov 0   ;;  %p192_p10 = scmp.lt.s32.totalorder %s737_s12, 1  ;;  %vm389_vm8 = vcmask 7168  }
  0x39   : > { %v211_v2 = vshrl.u32 %v210_v0, 7  ;;  %v214_v3 = vand.u32 127, %v210_v0  ;;  %556 = vmatprep.subr.bf16.mxu1 %v756_v1  ;;  %558 = vmatprep.mubr.msk.bf16.mxu1 %vm757_vm0, %v756_v1  ;;  %s956_s13 = smov (!%p190_p7, %s741_s13), 1 }
  0x3a   : > { %v209_v15 = vmin.f32 %v208_v10, 1e+08  ;;  %s958_s12 = smov (!%p192_p10, %s737_s12), 1  ;;  %s541_s23 = sshll.u32 %s956_s13, 1 }
  0x3b   : > { %v212_v4 = vadd.s32 8, %v211_v2  ;;  %v215_v5 = vmul.u32 2, %v214_v3  ;;  %s195_s5 = sadd.s32 %s541_s23, %s958_s12 }
  0x3c   : > { %v228_v17 = vpack.c.bf16 %v209_v15, %v209_v15  ;;  %s542_s8 = sshll.u32 %s195_s5, 3 }
  0x3d   : > { %v216_v6 = vadd.s32 1, %v215_v5  ;;  %vm221_vm1 = vcmp.eq.s32.totalorder %v211_v2, %v215_v5  ;;  %vm222_vm2 = vcmp.eq.s32.totalorder %v212_v4, %v215_v5  ;;  %s197_s21 = scalar_lea.vmem %s935_s1, %s542_s8  ;;  %s205_s25 = scalar_lea.vmem %s936_s2, %s542_s8 }
  0x3e   : > { %v223_v7 = vsel %vm221_vm1, 1.0, %v756_v1  ;;  %v224_v8 = vsel %vm222_vm2, 1.0, %v756_v1  ;;  %v229_v18 = vunpack.c.l.bf16 %v228_v17 }
  0x3f   : > { %vm217_vm3 = vcmp.eq.s32.totalorder %v211_v2, %v216_v6  ;;  %vm218_vm4 = vcmp.eq.s32.totalorder %v212_v4, %v216_v6 }
  0x40   : > { %v219_v11 = vsel %vm217_vm3, 1.0, %v756_v1  ;;  %v220_v12 = vsel %vm218_vm4, 1.0, %v756_v1  ;;  %v230_v19 = vsub.f32 %v209_v15, %v229_v18 }
  0x41   : > { %v225_v13 = vsub.f32 %v219_v11, %v223_v7  ;;  %v226_v14 = vsub.f32 %v220_v12, %v224_v8 }
  0x42   : > { %v231_v20 = vpack.c.bf16 %v230_v19, %v230_v19 }
  0x43   : > { %v227_v16 = vpack.c.bf16 %v226_v14, %v225_v13 }
  0x44   : > { %v232_v21 = vunpack.c.l.bf16 %v231_v20 }
  0x45   : > { %563 = vmatpush3.bf16.msra.mxu0 %v227_v16  ;;  %557 = vmatpush3.bf16.msra.mxu1 %v227_v16 }
  0x46   : > { %568 = vmatprep.subr.bf16.mxu0 %v756_v1  ;;  %v233_v22 = vsub.f32 %v230_v19, %v232_v21 }
  0x48   : > { %565 = vmatmul.mubr.msk.bf16.vlgmr.msra.gmra.mrb[0].mxu0 %vm235_vm5, %v228_v17  ;;  %559 = vmatmul.mubr.msk.bf16.vlgmr.msra.gmra.mrb[0].mxu1 %vm235_vm5, %v231_v20  ;;  %v234_v23 = vpack.c.bf16 %v233_v22, %v233_v22 }
  0x49   : > { %569 = vmatpush3.bf16.msra.mxu0 %v227_v16  ;;  %570 = vmatprep.mubr.msk.bf16.mxu0 %vm757_vm0, %v756_v1 }
  0x54   : > { %571 = vmatmul.mubr.msk.bf16.vlgmr.msra.gmra.mrb[0].mxu0 %vm235_vm5, %v234_v23 }
 0x11b   : > { %v273_v24 = vpop.f32.mrb[0].mxu1 }
 0x11c   : > { %v560_v25 = vpop.f32.mrb[1].mxu1 }
 0x11d   : > { %v276_v26 = vpop.f32.mrb[2].mxu1 }
 0x11e   : > { %v561_v27 = vpop.f32.mrb[3].mxu1 }
 0x127   : > { %v359_v28 = vpop.f32.mrb[0].mxu0 }
 0x128   : > { %v574_v29 = vadd.f32 %v359_v28, %v273_v24  ;;  %v572_v30 = vpop.f32.mrb[1].mxu0 }
 0x129   : > { %v362_v31 = vpop.f32.mrb[2].mxu0 }
 0x12a   : > { %v366_v32 = vsub.f32 0.0, %v574_v29  ;;  %vm374_vm7 = vcmp.gt.f32.partialorder %v574_v29, 0.0  ;;  %v573_v33 = vpop.f32.mrb[3].mxu0 }
 0x12b   : > { %v375_v35 = vsel %vm374_vm7, 1, %v758_v34 }
 0x12c   : > { %v367_v36 = vmul.f32 1.442695, %v366_v32  ;;  %v376_v37 = vsel %vm372_vm6, %v375_v35, 0 }
 0x12d   : > { %v378_v38 = vshrl.u32 %v376_v37, 16  ;;  %v377_v40 = vand.u32 65535, %v376_v37 }
 0x12e   : > { %653 = vpow2.f32 %v367_v36 }
 0x12f   : > { %v380_v39 = vcvt.s32.f32 %v378_v38  ;;  %v379_v41 = vcvt.s32.f32 %v377_v40 }
 0x131   : > { %383 = vadd.xlane.f32.xlu0 %v380_v39 }
 0x135   : > { %381 = vadd.xlane.f32.xlu0 %v379_v41 }
 0x138   : > { %v654_v42 = vpop.eup %653 }
 0x139   : > { %v369_v43 = vadd.f32 1.0, %v654_v42 }
 0x13b   : > { %655 = vrcp.f32 %v369_v43 }
 0x145   : > { %v656_v44 = vpop.eup %655 }
 0x146   : > { %373 = vst.msk [vmem:[%s197_s21] sm:$0xff] %vm372_vm6, %v656_v44 }
 0x1be   : > { %v384_v45 = vpop.xlane.xlu0 %383 }
 0x1bf   : > { %v386_v46 = vcvt.f32.s32 %v384_v45 }
 0x1c1   : > { %v387_v48 = vshll.u32 %v386_v46, 16 }
 0x1c2   : > { %v382_v47 = vpop.xlane.xlu0 %381 }
 0x1c3   : > { %v385_v49 = vcvt.f32.s32 %v382_v47 }
 0x1c5   : > { %v388_v50 = vadd.s32 %v387_v48, %v385_v49 }
 0x1c7   : > { %390 = vst.msk [vmem:[%s205_s25] sm:$0xff] %vm389_vm8, %v388_v50 }
 0x1c8 PF: > { %s16_s16 = sadd.s32 1, %s753_s16   ;;  %s942_s9 = smov %s729_s10 }
 0x1c9   : > { %p13_p11 = scmp.ge.s32.totalorder %s16_s16, 6   ;;  %s943_s10 = smov %s733_s11 }
 0x1ca   : > { %s944_s11 = smov %s841_s29  ;;  %s945_s12 = smov %s745_s14 }
 0x1cb   : > { %s946_s13 = smov %s749_s15  ;;  %s947_s14 = smov %s950_s18 }
 0x1cc   : > { %s948_s15 = smov %s954_s19  ;;  %15 = sbr.rel (!%p13_p11) target bundleno = 5 (0x5), region = 76 }
 0x1d3   :  { %440 = vsyncpa [#allocation3], 1 }
 0x1d4   :  { %442 = vsyncpa [#allocation3 + $0x1], 1 }

</bundles_post_ra>
